<compile_context>
chip_gen: v7x
topology: tpu7x:2x2x1
jax: 0.10.0
libtpu: 0.0.40
codegen_flags: <defaults>
</compile_context>

<pallas_src>
import jax
import jax.numpy as jnp
from jax import lax
from jax.experimental import pallas as pl
from jax.experimental.pallas import tpu as pltpu

HIDDEN = 128          # Critic.HIDDEN_LAYER_SIZE
W1_ROWS = 8           # rows 0..7 of the packed params hold w1 (zero padded)
ROW_B1 = 8            # row holding b1
ROW_W2T = 9           # row holding w2^T (value head, lane-dense)
ROW_B2 = 10           # row holding b2 (lane 0)
PARAM_ROWS = 16       # packed params padded to a multiple of 8 sublanes


def _critic_kernel(x_ref, p_ref, out_ref):
    x = x_ref[...]                               # (tile_b, d_in) f32
    d_in = x_ref.shape[1]
    w1 = p_ref[0:d_in, :]                        # (d_in, H)
    b1 = p_ref[ROW_B1:ROW_B1 + 1, :]             # (1, H)
    w2t = p_ref[ROW_W2T:ROW_W2T + 1, :]          # (1, H)
    b2 = p_ref[ROW_B2:ROW_B2 + 1, 0:1]           # (1, 1)

    # Hidden layer: one MXU pass (K = d_in, padded internally); bias + ReLU on VPU.
    h = jnp.dot(x, w1, preferred_element_type=jnp.float32)       # (tile_b, H)
    h = jnp.maximum(h + b1, 0.0)

    # Value head on the MXU in NT form (contract the hidden dim of both
    # operands): result is (1, tile_b), i.e. batch lands on lanes, so the
    # output store is lane-dense and the writeback DMA is contiguous.
    v = lax.dot_general(w2t, h, (((1,), (1,)), ((), ())),
                        preferred_element_type=jnp.float32)      # (1, tile_b)
    out_ref[...] = v + b2


def critic_forward(x, params, *, tile_b=8192):
    """x: (B, d_in) f32 with d_in <= 8; params: packed (16, 128) f32.

    Returns (B, 1) f32, matching Critic.forward.
    """
    B, d_in = x.shape
    assert d_in <= W1_ROWS, "packed layout holds w1 in the first 8 rows"
    assert params.shape == (PARAM_ROWS, HIDDEN)

    if B <= tile_b:
        # One full-extent block: any B allowed, no padding, single grid step.
        tile_b = B
    else:
        # Multi-step grid: keep the batch tile a multiple of 128 so the
        # (1, tile_b) output block stays lane-dense; the ragged last tile is
        # clipped by the Pallas pipeline (per-row math -> no masking needed).
        tile_b = max(128, (tile_b // 128) * 128)

    grid = (pl.cdiv(B, tile_b),)
    out = pl.pallas_call(
        _critic_kernel,
        out_shape=jax.ShapeDtypeStruct((1, B), jnp.float32),
        grid=grid,
        in_specs=[
            pl.BlockSpec((tile_b, d_in), lambda i: (i, 0)),         # batch tiles
            pl.BlockSpec((PARAM_ROWS, HIDDEN), lambda i: (0, 0)),   # resident params
        ],
        out_specs=pl.BlockSpec((1, tile_b), lambda i: (0, i)),      # lane-dense out
        compiler_params=pltpu.CompilerParams(
            dimension_semantics=("parallel",),      # shard batch tiles across TCs
            vmem_limit_bytes=48 * 1024 * 1024,      # lane-padded x buffers at 8K rows
        ),
    )(x, params)
    return out.reshape(B, 1)


def init_params(key, inputs, hidden=HIDDEN):
    """nn.Linear-style init; returns raw (w1, b1, w2, b2) matching the spec."""
    k1, k2, k3, k4 = jax.random.split(key, 4)
    bound1 = 1.0 / jnp.sqrt(inputs)
    bound2 = 1.0 / jnp.sqrt(hidden)
    w1 = jax.random.uniform(k1, (inputs, hidden), jnp.float32, -bound1, bound1)
    b1 = jax.random.uniform(k2, (hidden,), jnp.float32, -bound1, bound1)
    w2 = jax.random.uniform(k3, (hidden, 1), jnp.float32, -bound2, bound2)
    b2 = jax.random.uniform(k4, (1,), jnp.float32, -bound2, bound2)
    return w1, b1, w2, b2


def pack_params(w1, b1, w2, b2):
    """Pack (w1, b1, w2, b2) into one lane-dense (16, 128) f32 array."""
    inputs = w1.shape[0]
    assert inputs <= W1_ROWS
    p = jnp.zeros((PARAM_ROWS, HIDDEN), jnp.float32)
    p = p.at[:inputs, :].set(w1)
    p = p.at[ROW_B1, :].set(b1)
    p = p.at[ROW_W2T, :].set(w2[:, 0])
    p = p.at[ROW_B2, 0].set(b2[0])
    return p


if __name__ == "__main__":
    key = jax.random.PRNGKey(0)
    k_x, k_p, k_x2 = jax.random.split(key, 3)

    inputs = 3  # Pendulum-v1 observation dim
    w1, b1, w2, b2 = init_params(k_p, inputs)
    params = pack_params(w1, b1, w2, b2)

    def ref_fn(x):
        return jnp.maximum(x @ w1 + b1[None, :], 0.0) @ w2 + b2[None, :]

    # Tolerance accommodates possible MXU default-precision differences between
    # the in-kernel and XLA reference matmuls; real layout/indexing bugs are O(1).
    ATOL = 2e-3
    RTOL = 2e-3

    # Small batch: single full-extent block.
    x = jax.random.normal(k_x, (64, inputs), dtype=jnp.float32)
    out = jax.block_until_ready(critic_forward(x, params))
    assert out.shape == (64, 1)
    assert jnp.allclose(out, ref_fn(x), atol=ATOL, rtol=RTOL)

    # Multi-step grid with a ragged last tile (300 = 2 * 128 + 44):
    # exercises the cdiv grid, clipped output block, and resident params.
    x2 = jax.random.normal(k_x2, (300, inputs), dtype=jnp.float32)
    out2 = jax.block_until_ready(critic_forward(x2, params, tile_b=128))
    assert out2.shape == (300, 1)
    assert jnp.allclose(out2, ref_fn(x2), atol=ATOL, rtol=RTOL)

    print("KERNEL_OK")
</pallas_src>

<mosaic_0001>
module attributes {stable_mosaic.version = 11 : i64} {
  func.func @_critic_kernel(%arg0: i32, %arg1: memref<64x3xf32, #tpu.memory_space<vmem>>, %arg2: memref<16x128xf32, #tpu.memory_space<vmem>>, %arg3: memref<1x64xf32, #tpu.memory_space<vmem>>) attributes {dimension_semantics = [#tpu.dimension_semantics<parallel>], iteration_bounds = array<i64: 1>, scalar_prefetch = 0 : i64, scratch_operands = 0 : i64, tpu.core_type = #tpu.core_type<tc>, window_params = [{transform_indices = @transform_0, window_bounds = array<i64: 64, 3>}, {pipeline_mode = #tpu.pipeline_mode<synchronous>, transform_indices = @transform_1, window_bounds = array<i64: 16, 128>}, {transform_indices = @transform_2, window_bounds = array<i64: 1, 64>}]} {
    %c0 = arith.constant 0 : index
    %c0_0 = arith.constant 0 : index
    %0 = vector.load %arg1[%c0, %c0_0] : memref<64x3xf32, #tpu.memory_space<vmem>>, vector<64x3xf32>
    %c0_1 = arith.constant 0 : index
    %c0_2 = arith.constant 0 : index
    %1 = vector.load %arg2[%c0_1, %c0_2] : memref<16x128xf32, #tpu.memory_space<vmem>>, vector<3x128xf32>
    %c8 = arith.constant 8 : index
    %c0_3 = arith.constant 0 : index
    %2 = vector.load %arg2[%c8, %c0_3] : memref<16x128xf32, #tpu.memory_space<vmem>>, vector<1x128xf32>
    %c9 = arith.constant 9 : index
    %c0_4 = arith.constant 0 : index
    %3 = vector.load %arg2[%c9, %c0_4] : memref<16x128xf32, #tpu.memory_space<vmem>>, vector<1x128xf32>
    %c10 = arith.constant 10 : index
    %c0_5 = arith.constant 0 : index
    %4 = vector.load %arg2[%c10, %c0_5] : memref<16x128xf32, #tpu.memory_space<vmem>>, vector<1x1xf32>
    %cst = arith.constant dense<0.000000e+00> : vector<64x128xf32>
    %5 = tpu.matmul %0, %1, %cst {dimension_numbers = #tpu.dot_dimension_numbers<[1], [0], [0], [1], [0, 0, 1, 1], [], []>} : vector<64x3xf32>, vector<3x128xf32>, vector<64x128xf32> -> vector<64x128xf32>
    %6 = vector.broadcast %2 : vector<1x128xf32> to vector<64x128xf32>
    %7 = arith.addf %5, %6 : vector<64x128xf32>
    %cst_6 = arith.constant 0.000000e+00 : f32
    %8 = vector.broadcast %cst_6 : f32 to vector<64x128xf32>
    %9 = arith.maximumf %7, %8 : vector<64x128xf32>
    %cst_7 = arith.constant dense<0.000000e+00> : vector<1x64xf32>
    %10 = tpu.matmul %3, %9, %cst_7 {dimension_numbers = #tpu.dot_dimension_numbers<[1], [1], [0], [0], [0, 0, 1, 0], [], []>} : vector<1x128xf32>, vector<64x128xf32>, vector<1x64xf32> -> vector<1x64xf32>
    %11 = vector.broadcast %4 : vector<1x1xf32> to vector<1x64xf32>
    %12 = arith.addf %10, %11 : vector<1x64xf32>
    %c0_8 = arith.constant 0 : index
    %c0_9 = arith.constant 0 : index
    %13 = vector.load %arg3[%c0_8, %c0_9] : memref<1x64xf32, #tpu.memory_space<vmem>>, vector<1x64xf32>
    tpu.vector_store %arg3[%c0_8, %c0_9], %12 {strides = array<i32>} : memref<1x64xf32, #tpu.memory_space<vmem>>, vector<1x64xf32>,
    return
  }
  func.func @transform_0(%arg0: i32) -> (i32, i32) {
    %c0_i32 = arith.constant 0 : i32
    %c0_i32_0 = arith.constant 0 : i32
    return %arg0, %c0_i32 : i32, i32
  }
  func.func @transform_1(%arg0: i32) -> (i32, i32) {
    %c0_i32 = arith.constant 0 : i32
    %c0_i32_0 = arith.constant 0 : i32
    %c0_i32_1 = arith.constant 0 : i32
    return %c0_i32, %c0_i32_0 : i32, i32
  }
  func.func @transform_2(%arg0: i32) -> (i32, i32) {
    %c0_i32 = arith.constant 0 : i32
    %c0_i32_0 = arith.constant 0 : i32
    return %c0_i32, %arg0 : i32, i32
  }
}

</mosaic_0001>

<bundles_post_ra>
// kernel: tpu_custom_call.1
= control target key start
LH: loop header
LB: loop body
LE: loop exit
PB: predicated region body
PF: predicated region fallthrough
CT: control target
= control target key end

     0   :  { %vm53_vm0 = vcmask 1042432   ;;  %vm28_vm1 = vcmask 23552   ;;  %s440_s0 = inlined_call_operand.vmem [shape: f32[64,3], index: 0, kind: input, shape index: {}]   ;;  %s441_s1 = inlined_call_operand.vmem [shape: f32[16,128], index: 1, kind: input, shape index: {}]   ;;  %s442_s2 = inlined_call_operand.hbm [shape: f32[1,64], index: 2, kind: output, shape index: {}]  }
   0x1   :  { %v20_v0 = vld [vmem:[%s441_s1] sm:$0x7]  ;;  %v13_v2 = vld [vmem:[%s440_s0 + $0x8] sm:$0xff]  ;;  %v14_v3 = vld [vmem:[%s440_s0 + $0x10] sm:$0xff] }
   0x2   :  { %v12_v1 = vld [vmem:[%s440_s0] sm:$0xff]  ;;  %289 = vmatprep.subr.msk.mxu0 %vm53_vm0, %v20_v0 }
   0x3   :  { %291 = vmatprep.mubr.msk.f32.mxu0 %vm28_vm1, %v12_v1  ;;  %290 = vmatpush3.msk.msra.mxu0 %vm53_vm0, %v20_v0 }
   0x4   :  { %292 = vmatmul.mubr.msk.f32.vlgmr.msra.gmra.mrb[0].mxu0 %vm28_vm1, %v13_v2 }
   0x5   :  { %7 = vsyncpa [#allocation3], 0  ;;  %294 = vmatprep.mubr.msk.f32.mxu0 %vm28_vm1, %v14_v3  ;;  %v15_v4 = vld [vmem:[%s440_s0 + $0x18] sm:$0xff]  ;;  %v16_v5 = vld [vmem:[%s440_s0 + $0x20] sm:$0xff]  ;;  %v364_v9 = vmov 0.0|0.0   ;;  %vm365_vm2 = vmmov 0  }
   0x6   :  { %v17_v6 = vld [vmem:[%s440_s0 + $0x28] sm:$0xff]  ;;  %v18_v7 = vld [vmem:[%s440_s0 + $0x30] sm:$0xff]  ;;  %v19_v8 = vld [vmem:[%s440_s0 + $0x38] sm:$0xff]  ;;  %322 = vmatprep.subr.bf16.mxu1 %v364_v9  ;;  %v366_v10 = vmov 0.0   ;;  %v367_v12 = vmov 0   ;;  %s368_s4 = smov [#allocation2]  }
   0x7   :  { %319 = vmatprep.mubr.msk.f32.mxu1 %vm365_vm2, %v366_v10  ;;  %v23_v11 = vld [vmem:[%s441_s1 + $0xa] sm:$0x1]  ;;  %339 = vset.pattern.permute.xlu0 %v367_v12  ;;  %v261_v13 = vld [vmem:[%s441_s1 + $0x8] ss:$0 sm:$0xff]  ;;  %v22_v42 = vld [vmem:[%s441_s1 + $0x9] sm:$0x1] }
   0x8   :  { %295 = vmatmul.mubr.msk.f32.gmra.mrb[2].mxu0 %vm28_vm1, %v15_v4  ;;  %172 = vperm.xlu0 %339, %v23_v11   ;;  %s253_s5 = sshll.u32 %s368_s4, 4  ;;  %vm245_vm3 = vcmask 516096   ;;  %s254_s5 = int_to_ptr.vmem [resolvable:$true] %s253_s5 }
   0x9   :  { %297 = vmatprep.mubr.msk.f32.mxu0 %vm28_vm1, %v16_v5  ;;  %s340_s6 = scalar_lea.vmem %s254_s5, 16  ;;  %s344_s7 = scalar_lea.vmem %s254_s5, 32 }
   0xa   :  { %p341_p0 = scmp.ne.s32.totalorder %s254_s5, %s340_s6  ;;  %p345_p1 = scmp.lt.s32.totalorder %s254_s5, %s254_s5 }
   0xb   :  { %p346_p2 = scmp.lt.s32.totalorder %s344_s7, %s340_s6 }
   0xc   :  { %298 = vmatmul.mubr.msk.f32.gmra.mrb[4].mxu0 %vm28_vm1, %v17_v6 }
   0xd   :  { %300 = vmatprep.mubr.msk.f32.mxu0 %vm28_vm1, %v18_v7  ;;  %p347_p3 = por %p346_p2, %p345_p1 }
   0xf   :  { %p348_p4 = pnand %p347_p3, %p341_p0 }
  0x10   :  { %301 = vmatmul.mubr.msk.f32.gmra.mrb[6].mxu0 %vm28_vm1, %v19_v8 }
  0x87   :  { %v173_v43 = vpop.permute.xlu0 %172 }
  0xd7   :  { %v293_v14 = vpop.f32.mrb[0].mxu0 }
  0xd8   :  { %v129_v15 = vadd.f32 %v293_v14, %v261_v13  ;;  %v123_v16 = vpop.f32.mrb[1].mxu0 }
  0xd9   :  { %v124_v17 = vadd.f32 %v261_v13, %v123_v16 }
  0xda   :  { %v163_v18 = vmax.f32 %v129_v15, 0.0 }
  0xdb   :  { %v162_v19 = vmax.f32 %v124_v17, 0.0  ;;  %v296_v20 = vpop.f32.mrb[2].mxu0 }
  0xdc   :  { %v139_v21 = vadd.f32 %v296_v20, %v261_v13  ;;  %v133_v22 = vpop.f32.mrb[3].mxu0 }
  0xdd   :  { %v134_v23 = vadd.f32 %v261_v13, %v133_v22  ;;  %v323_v24 = vpack.c.bf16 %v163_v18, %v162_v19 }
  0xde   :  { %v165_v25 = vmax.f32 %v139_v21, 0.0 }
  0xdf   :  { %v164_v26 = vmax.f32 %v134_v23, 0.0  ;;  %324 = vmatpush3.bf16.xpose.msra.mxu1 %v323_v24  ;;  %v299_v27 = vpop.f32.mrb[4].mxu0 }
  0xe0   :  { %v149_v28 = vadd.f32 %v299_v27, %v261_v13  ;;  %325 = vmatprep.subr.bf16.mxu1 %v364_v9  ;;  %v143_v29 = vpop.f32.mrb[5].mxu0 }
  0xe1   :  { %v326_v30 = vpack.c.bf16 %v165_v25, %v164_v26  ;;  %v144_v31 = vadd.f32 %v261_v13, %v143_v29 }
  0xe2   :  { %v167_v32 = vmax.f32 %v149_v28, 0.0 }
  0xe3   :  { %v166_v33 = vmax.f32 %v144_v31, 0.0  ;;  %v302_v34 = vpop.f32.mrb[6].mxu0 }
  0xe4   :  { %v159_v35 = vadd.f32 %v302_v34, %v261_v13  ;;  %v153_v36 = vpop.f32.mrb[7].mxu0 }
  0xe5   :  { %v329_v37 = vpack.c.bf16 %v167_v32, %v166_v33  ;;  %v154_v38 = vadd.f32 %v261_v13, %v153_v36 }
  0xe6   :  { %v169_v39 = vmax.f32 %v159_v35, 0.0 }
  0xe7   :  { %327 = vmatpush3.bf16.xpose.msra.mxu1 %v326_v30  ;;  %v168_v40 = vmax.f32 %v154_v38, 0.0 }
  0xe8   :  { %328 = vmatprep.subr.bf16.mxu1 %v364_v9 }
  0xe9   :  { %v332_v41 = vpack.c.bf16 %v169_v39, %v168_v40 }
  0xef   :  { %330 = vmatpush3.bf16.xpose.msra.mxu1 %v329_v37 }
  0xf0   :  { %331 = vmatprep.subr.bf16.mxu1 %v364_v9 }
  0xf7   :  { %333 = vmatpush3.bf16.xpose.msra.mxu1 %v332_v41 }
  0xfe   :  { %320 = vmatmul.mubr.f32.vlgmr.msra.gmra.mrb[0].mxu1 %v22_v42 }
 0x1d1   :  { %v241_v44 = vpop.f32.mrb[0].mxu1 }
 0x1d2   :  { %v242_v45 = vadd.f32 %v241_v44, %v173_v43  ;;  %v321_v46 = vpop.f32.mrb[1].mxu1 }
 0x1d4   :  { %246 = vst.msk [vmem:[#allocation2] sm:$0x1] %vm245_vm3, %v242_v45 }
 0x1d5   :  { %351 = shalt.err (!%p348_p4)
}
 0x1d6   :  { %s352_s9 = scalar_lea.hbm %s442_s2, 16 }
 0x1d7   :  { %p353_p5 = scmp.ne.s32.totalorder %s442_s2, %s352_s9  ;;  %p356_p6 = scmp.lt.u32.totalorder %s352_s9, %s442_s2 }
 0x1d9   :  { %p358_p7 = pnand %p356_p6, %p353_p5 }
 0x1db   :  { %361 = shalt.err (!%p358_p7)
}
 0x1dc   :  { %256 = dma.vmem_to_hbm [thread:$0]  %s254_s5, 16, %s442_s2, [#allocation3]  }
 0x1dd   :  { %362 = dma.done.wait [#allocation3], 16  }
 0x1de   :  { %363 = vsyncadd [#allocation3], 4294967280 }
 0x1df   :  { %260 = vsyncpa [#allocation3], 1 }

</bundles_post_ra>
